<compile_context>
chip_gen: v5e
topology: v5e:2x2
jax: 0.10.0
libtpu: 0.0.40
codegen_flags: <defaults>
</compile_context>

<pallas_src>
import math

import jax
import jax.numpy as jnp
from jax.experimental import pallas as pl
from jax.experimental.pallas import tpu as pltpu


def _round_up(x, m):
    return ((x + m - 1) // m) * m


def _vmem_capacity_bytes():
    """Physical VMEM of the local TPU generation (conservative fallback)."""
    try:
        info = pltpu.get_tpu_info()
        cap = getattr(info, "vmem_capacity_bytes", None)
        if cap:
            return int(cap)
    except Exception:
        pass
    return 64 * 1024 * 1024  # v7x-sized fallback (most restrictive)


def _vmem_need(tm, tk, n_embd_p, out_itemsize, single_buffer_weights):
    """Rough VMEM footprint of one grid step (incl. pipeline buffers)."""
    wbuf = 1 if single_buffer_weights else 2
    w = wbuf * 2 * n_embd_p * tk * 2          # W1 + W2 tiles, bf16
    b = wbuf * tk * 4 + n_embd_p * 4          # b1 tile(s) + b2, f32
    x = 2 * tm * n_embd_p * 2                 # x tile, bf16, double-buffered
    o = 2 * tm * n_embd_p * out_itemsize      # out tile, double-buffered
    acc = tm * n_embd_p * 4                   # f32 accumulator scratch
    h = 2 * tm * tk * 4                       # f32 GELU intermediate + temps
    return w + b + x + o + acc + h


def _choose_tk(tm, n_embd_p, n_state_p, out_itemsize, budget):
    """Largest hidden tile that fits the VMEM budget (full residency first)."""
    if _vmem_need(tm, n_state_p, n_embd_p, out_itemsize, True) <= budget:
        return n_state_p
    tk = n_state_p
    while tk > 128:
        tk = max(128, _round_up(tk // 2, 128))
        if _vmem_need(tm, tk, n_embd_p, out_itemsize, False) <= budget:
            return tk
    return 128


def _mlp_kernel(x_ref, w1_ref, b1_ref, w2_ref, b2_ref, o_ref, acc_ref):
    # x_ref  : (TM, n_embd_p)      bf16
    # w1_ref : (n_embd_p, TK)      bf16     b1_ref : (1, TK)        f32
    # w2_ref : (TK, n_embd_p)      bf16     b2_ref : (1, n_embd_p)  f32
    # o_ref  : (TM, n_embd_p)      out dtype
    # acc_ref: (TM, n_embd_p)      f32 accumulator over hidden tiles
    j = pl.program_id(1)

    @pl.when(j == 0)
    def _init():
        acc_ref[...] = jnp.zeros_like(acc_ref)

    # c_fc slice: (TM, n_embd) @ (n_embd, TK) on the MXU, f32 accumulate.
    h = jnp.dot(x_ref[...], w1_ref[...],
                preferred_element_type=jnp.float32) + b1_ref[...]

    # tanh-approximation GELU in f32 (tanh -> EUP slot, hidden behind MXU).
    c = jnp.float32(math.sqrt(2.0 / math.pi))
    h = 0.5 * h * (1.0 + jnp.tanh(c * (h + 0.044715 * (h * h * h))))

    # c_proj slice: (TM, TK) @ (TK, n_embd), accumulated over hidden tiles.
    acc_ref[...] += jnp.dot(h.astype(w2_ref.dtype), w2_ref[...],
                            preferred_element_type=jnp.float32)

    @pl.when(j == pl.num_programs(1) - 1)
    def _store():
        o_ref[...] = (acc_ref[...] + b2_ref[...]).astype(o_ref.dtype)


def mlp_pallas(x, w1, b1, w2, b2, *, tm=512):
    """Computes c_proj(gelu(c_fc(x))).

    x: (..., n_embd).  w1: (n_embd, n_state), w2: (n_state, n_embd) -- i.e.
    the transpose of PyTorch nn.Linear's (out, in) weight layout.
    """
    n_embd = x.shape[-1]
    n_state = w1.shape[1]
    lead_shape = x.shape[:-1]
    out_dtype = x.dtype
    out_itemsize = jnp.dtype(out_dtype).itemsize

    x2d = x.reshape(-1, n_embd)
    n_tok = x2d.shape[0]

    # Lane-dense feature dims (multiples of 128); token tile multiple of 16
    # (bf16 sublane packing, also satisfies f32's 8).
    n_embd_p = _round_up(n_embd, 128)
    tok_align = 16
    tm = _round_up(min(tm, _round_up(n_tok, tok_align)), tok_align)
    # Prefer >= 2 token steps so both v7x TensorCores get work.
    if n_tok > tok_align and _round_up(n_tok, tm) == tm:
        tm = min(tm, _round_up((n_tok + 1) // 2, tok_align))
    n_tok_p = _round_up(n_tok, tm)

    phys_vmem = _vmem_capacity_bytes()
    budget = int(phys_vmem * 0.75)            # ~96 MiB v5e/v6e, ~48 MiB v7x

    tk = _choose_tk(tm, n_embd_p, _round_up(n_state, 128), out_itemsize, budget)
    n_state_p = _round_up(n_state, tk)
    n_hidden = n_state_p // tk
    single_buffer_w = (n_hidden == 1)

    # bf16 MXU operands (f32 accumulation in-kernel); biases stay f32.
    # TODO(synk): in a real model, pre-cast/pre-pad the weights once outside
    # the per-call path instead of here.
    x_c = x2d.astype(jnp.bfloat16)
    w1_c = w1.astype(jnp.bfloat16)
    w2_c = w2.astype(jnp.bfloat16)
    b1_c = b1.astype(jnp.float32)
    b2_c = b2.astype(jnp.float32)

    # Zero padding is inert through both linears + GELU; skip when aligned.
    if x_c.shape != (n_tok_p, n_embd_p):
        x_c = jnp.pad(x_c, ((0, n_tok_p - n_tok), (0, n_embd_p - n_embd)))
    if w1_c.shape != (n_embd_p, n_state_p):
        w1_c = jnp.pad(w1_c, ((0, n_embd_p - n_embd), (0, n_state_p - n_state)))
    if w2_c.shape != (n_state_p, n_embd_p):
        w2_c = jnp.pad(w2_c, ((0, n_state_p - n_state), (0, n_embd_p - n_embd)))
    if b1_c.shape[0] != n_state_p:
        b1_c = jnp.pad(b1_c, (0, n_state_p - n_state))
    if b2_c.shape[0] != n_embd_p:
        b2_c = jnp.pad(b2_c, (0, n_embd_p - n_embd))
    b1_c = b1_c.reshape(1, n_state_p)
    b2_c = b2_c.reshape(1, n_embd_p)

    need = _vmem_need(tm, tk, n_embd_p, out_itemsize, single_buffer_w)
    vmem_limit = int(min(max(int(1.5 * need), 32 * 1024 * 1024),
                         int(phys_vmem * 0.8)))

    # Constant-index operands: single pipeline buffer (no wasted double-buffer
    # VMEM).  When the hidden dim is tiled, W1/b1/W2 change per step and keep
    # the default double buffering so their DMAs overlap compute.
    w_mode = pl.Buffered(1) if single_buffer_w else None
    const_mode = pl.Buffered(1)

    grid = (n_tok_p // tm, n_hidden)

    out = pl.pallas_call(
        _mlp_kernel,
        out_shape=jax.ShapeDtypeStruct((n_tok_p, n_embd_p), out_dtype),
        grid_spec=pltpu.PrefetchScalarGridSpec(
            num_scalar_prefetch=0,
            grid=grid,
            in_specs=[
                pl.BlockSpec((tm, n_embd_p), lambda i, j: (i, 0)),
                pl.BlockSpec((n_embd_p, tk), lambda i, j: (0, j),
                             pipeline_mode=w_mode),
                pl.BlockSpec((1, tk), lambda i, j: (0, j),
                             pipeline_mode=w_mode),
                pl.BlockSpec((tk, n_embd_p), lambda i, j: (j, 0),
                             pipeline_mode=w_mode),
                pl.BlockSpec((1, n_embd_p), lambda i, j: (0, 0),
                             pipeline_mode=const_mode),
            ],
            out_specs=pl.BlockSpec((tm, n_embd_p), lambda i, j: (i, 0)),
            scratch_shapes=[pltpu.VMEM((tm, n_embd_p), jnp.float32)],
        ),
        compiler_params=pltpu.CompilerParams(
            dimension_semantics=("parallel", "arbitrary"),
            vmem_limit_bytes=vmem_limit,
        ),
    )(x_c, w1_c, b1_c, w2_c, b2_c)

    if (n_tok_p, n_embd_p) != (n_tok, n_embd):
        out = out[:n_tok, :n_embd]
    return out.reshape(*lead_shape, n_embd)


def _reference_mlp(x, w1, b1, w2, b2):
    c = math.sqrt(2.0 / math.pi)
    h = x @ w1 + b1
    h = 0.5 * h * (1.0 + jnp.tanh(c * (h + 0.044715 * jnp.power(h, 3))))
    return h @ w2 + b2


if __name__ == "__main__":
    # Small shapes consistent with the module: n_embd=32, n_state=4*n_embd.
    batch, seq, n_embd = 2, 8, 32
    n_state = 4 * n_embd

    key = jax.random.PRNGKey(0)
    kx, k1, kb1, k2, kb2 = jax.random.split(key, 5)

    # Deterministic synthetic parameters (nn.Linear: c_fc (n_state, n_embd),
    # c_proj (n_embd, n_state)), stored transposed as (in, out) for the kernel.
    bound1 = 1.0 / math.sqrt(n_embd)
    bound2 = 1.0 / math.sqrt(n_state)
    w1 = jax.random.uniform(k1, (n_embd, n_state), jnp.float32, -bound1, bound1)
    b1 = jax.random.uniform(kb1, (n_state,), jnp.float32, -bound1, bound1)
    w2 = jax.random.uniform(k2, (n_state, n_embd), jnp.float32, -bound2, bound2)
    b2 = jax.random.uniform(kb2, (n_embd,), jnp.float32, -bound2, bound2)

    x = jax.random.normal(kx, (batch, seq, n_embd), jnp.float32)

    out = mlp_pallas(x, w1, b1, w2, b2)
    out = jax.block_until_ready(out)

    ref = _reference_mlp(x, w1, b1, w2, b2)
    assert out.shape == (batch, seq, n_embd)
    # bf16 MXU operands (f32 accumulation) vs f32 reference -> loosened tol.
    assert jnp.allclose(out, ref, atol=2e-2, rtol=2e-2), "mismatch vs reference"

    print("KERNEL_OK")
</pallas_src>

<mosaic_0001>
module attributes {stable_mosaic.version = 11 : i64} {
  func.func @_mlp_kernel(%arg0: i32, %arg1: i32, %arg2: memref<16x128xbf16, #tpu.memory_space<vmem>>, %arg3: memref<128x128xbf16, #tpu.memory_space<vmem>>, %arg4: memref<1x128xf32, #tpu.memory_space<vmem>>, %arg5: memref<128x128xbf16, #tpu.memory_space<vmem>>, %arg6: memref<1x128xf32, #tpu.memory_space<vmem>>, %arg7: memref<16x128xf32, #tpu.memory_space<vmem>>, %arg8: memref<16x128xf32, #tpu.memory_space<vmem>>) attributes {dimension_semantics = [#tpu.dimension_semantics<parallel>, #tpu.dimension_semantics<arbitrary>], iteration_bounds = array<i64: 1, 1>, scalar_prefetch = 0 : i64, scratch_operands = 1 : i64, tpu.core_type = #tpu.core_type<tc>, window_params = [{transform_indices = @transform_0, window_bounds = array<i64: 16, 128>}, {pipeline_mode = #tpu.pipeline_mode<synchronous>, transform_indices = @transform_1, window_bounds = array<i64: 128, 128>}, {pipeline_mode = #tpu.pipeline_mode<synchronous>, transform_indices = @transform_2, window_bounds = array<i64: 1, 128>}, {pipeline_mode = #tpu.pipeline_mode<synchronous>, transform_indices = @transform_3, window_bounds = array<i64: 128, 128>}, {pipeline_mode = #tpu.pipeline_mode<synchronous>, transform_indices = @transform_4, window_bounds = array<i64: 1, 128>}, {transform_indices = @transform_5, window_bounds = array<i64: 16, 128>}]} {
    %c0_i32 = arith.constant 0 : i32
    %0 = arith.cmpi eq, %arg1, %c0_i32 : i32
    %1 = arith.extui %0 : i1 to i32
    %c0_i32_0 = arith.constant 0 : i32
    %2 = arith.cmpi ne, %1, %c0_i32_0 : i32
    scf.if %2 {
      %cst_19 = arith.constant 0.000000e+00 : f32
      %31 = vector.broadcast %cst_19 : f32 to vector<16x128xf32>
      %c0_20 = arith.constant 0 : index
      %c0_21 = arith.constant 0 : index
      %32 = vector.load %arg8[%c0_20, %c0_21] : memref<16x128xf32, #tpu.memory_space<vmem>>, vector<16x128xf32>
      tpu.vector_store %arg8[%c0_20, %c0_21], %31 {strides = array<i32>} : memref<16x128xf32, #tpu.memory_space<vmem>>, vector<16x128xf32>,
    } else {
    }
    %c0 = arith.constant 0 : index
    %c0_1 = arith.constant 0 : index
    %3 = vector.load %arg2[%c0, %c0_1] : memref<16x128xbf16, #tpu.memory_space<vmem>>, vector<16x128xbf16>
    %c0_2 = arith.constant 0 : index
    %c0_3 = arith.constant 0 : index
    %4 = vector.load %arg3[%c0_2, %c0_3] : memref<128x128xbf16, #tpu.memory_space<vmem>>, vector<128x128xbf16>
    %cst = arith.constant dense<0.000000e+00> : vector<16x128xf32>
    %5 = tpu.matmul %3, %4, %cst {dimension_numbers = #tpu.dot_dimension_numbers<[1], [0], [0], [1], [0, 0, 1, 1], [], []>} : vector<16x128xbf16>, vector<128x128xbf16>, vector<16x128xf32> -> vector<16x128xf32>
    %c0_4 = arith.constant 0 : index
    %c0_5 = arith.constant 0 : index
    %6 = vector.load %arg4[%c0_4, %c0_5] : memref<1x128xf32, #tpu.memory_space<vmem>>, vector<1x128xf32>
    %7 = vector.broadcast %6 : vector<1x128xf32> to vector<16x128xf32>
    %8 = arith.addf %5, %7 : vector<16x128xf32>
    %cst_6 = arith.constant 5.000000e-01 : f32
    %9 = vector.broadcast %cst_6 : f32 to vector<16x128xf32>
    %10 = arith.mulf %9, %8 : vector<16x128xf32>
    %11 = arith.mulf %8, %8 : vector<16x128xf32>
    %12 = arith.mulf %11, %8 : vector<16x128xf32>
    %cst_7 = arith.constant 4.471500e-02 : f32
    %13 = vector.broadcast %cst_7 : f32 to vector<16x128xf32>
    %14 = arith.mulf %13, %12 : vector<16x128xf32>
    %15 = arith.addf %8, %14 : vector<16x128xf32>
    %cst_8 = arith.constant 0.797884583 : f32
    %16 = vector.broadcast %cst_8 : f32 to vector<16x128xf32>
    %17 = arith.mulf %16, %15 : vector<16x128xf32>
    %18 = math.tanh %17 : vector<16x128xf32>
    %cst_9 = arith.constant 1.000000e+00 : f32
    %19 = vector.broadcast %cst_9 : f32 to vector<16x128xf32>
    %20 = arith.addf %19, %18 : vector<16x128xf32>
    %21 = arith.mulf %10, %20 : vector<16x128xf32>
    %c0_10 = arith.constant 0 : index
    %c0_11 = arith.constant 0 : index
    %22 = vector.load %arg8[%c0_10, %c0_11] : memref<16x128xf32, #tpu.memory_space<vmem>>, vector<16x128xf32>
    %23 = arith.truncf %21 : vector<16x128xf32> to vector<16x128xbf16>
    %c0_12 = arith.constant 0 : index
    %c0_13 = arith.constant 0 : index
    %24 = vector.load %arg5[%c0_12, %c0_13] : memref<128x128xbf16, #tpu.memory_space<vmem>>, vector<128x128xbf16>
    %cst_14 = arith.constant dense<0.000000e+00> : vector<16x128xf32>
    %25 = tpu.matmul %23, %24, %cst_14 {dimension_numbers = #tpu.dot_dimension_numbers<[1], [0], [0], [1], [0, 0, 1, 1], [], []>} : vector<16x128xbf16>, vector<128x128xbf16>, vector<16x128xf32> -> vector<16x128xf32>
    %26 = arith.addf %22, %25 : vector<16x128xf32>
    %c0_15 = arith.constant 0 : index
    %c0_16 = arith.constant 0 : index
    %27 = vector.load %arg8[%c0_15, %c0_16] : memref<16x128xf32, #tpu.memory_space<vmem>>, vector<16x128xf32>
    tpu.vector_store %arg8[%c0_15, %c0_16], %26 {strides = array<i32>} : memref<16x128xf32, #tpu.memory_space<vmem>>, vector<16x128xf32>,
    %c0_i32_17 = arith.constant 0 : i32
    %28 = arith.cmpi eq, %arg1, %c0_i32_17 : i32
    %29 = arith.extui %28 : i1 to i32
    %c0_i32_18 = arith.constant 0 : i32
    %30 = arith.cmpi ne, %29, %c0_i32_18 : i32
    scf.if %30 {
      %c0_19 = arith.constant 0 : index
      %c0_20 = arith.constant 0 : index
      %31 = vector.load %arg8[%c0_19, %c0_20] : memref<16x128xf32, #tpu.memory_space<vmem>>, vector<16x128xf32>
      %c0_21 = arith.constant 0 : index
      %c0_22 = arith.constant 0 : index
      %32 = vector.load %arg6[%c0_21, %c0_22] : memref<1x128xf32, #tpu.memory_space<vmem>>, vector<1x128xf32>
      %33 = vector.broadcast %32 : vector<1x128xf32> to vector<16x128xf32>
      %34 = arith.addf %31, %33 : vector<16x128xf32>
      %c0_23 = arith.constant 0 : index
      %c0_24 = arith.constant 0 : index
      %35 = vector.load %arg7[%c0_23, %c0_24] : memref<16x128xf32, #tpu.memory_space<vmem>>, vector<16x128xf32>
      tpu.vector_store %arg7[%c0_23, %c0_24], %34 {strides = array<i32>} : memref<16x128xf32, #tpu.memory_space<vmem>>, vector<16x128xf32>,
    } else {
    }
    return
  }
  func.func @transform_0(%arg0: i32, %arg1: i32) -> (i32, i32) {
    %c0_i32 = arith.constant 0 : i32
    %c0_i32_0 = arith.constant 0 : i32
    return %arg0, %c0_i32 : i32, i32
  }
  func.func @transform_1(%arg0: i32, %arg1: i32) -> (i32, i32) {
    %c0_i32 = arith.constant 0 : i32
    %c0_i32_0 = arith.constant 0 : i32
    return %c0_i32, %arg1 : i32, i32
  }
  func.func @transform_2(%arg0: i32, %arg1: i32) -> (i32, i32) {
    %c0_i32 = arith.constant 0 : i32
    %c0_i32_0 = arith.constant 0 : i32
    return %c0_i32, %arg1 : i32, i32
  }
  func.func @transform_3(%arg0: i32, %arg1: i32) -> (i32, i32) {
    %c0_i32 = arith.constant 0 : i32
    %c0_i32_0 = arith.constant 0 : i32
    return %arg1, %c0_i32 : i32, i32
  }
  func.func @transform_4(%arg0: i32, %arg1: i32) -> (i32, i32) {
    %c0_i32 = arith.constant 0 : i32
    %c0_i32_0 = arith.constant 0 : i32
    %c0_i32_1 = arith.constant 0 : i32
    return %c0_i32, %c0_i32_0 : i32, i32
  }
  func.func @transform_5(%arg0: i32, %arg1: i32) -> (i32, i32) {
    %c0_i32 = arith.constant 0 : i32
    %c0_i32_0 = arith.constant 0 : i32
    return %arg0, %c0_i32 : i32, i32
  }
}

</mosaic_0001>

<bundles_post_ra>
// kernel: tpu_custom_call.1
= control target key start
LH: loop header
LB: loop body
LE: loop exit
PB: predicated region body
PF: predicated region fallthrough
CT: control target
= control target key end

     0   :  { %10 = vsyncpa [#allocation4], 0  ;;  %s557_s0 = inlined_call_operand.hbm [shape: bf16[16,128], index: 0, kind: input, shape index: {}]   ;;  %s558_s1 = inlined_call_operand.hbm [shape: bf16[128,128], index: 1, kind: input, shape index: {}]   ;;  %s559_s2 = inlined_call_operand.vmem [shape: f32[1,128], index: 2, kind: input, shape index: {}]   ;;  %s560_s3 = inlined_call_operand.hbm [shape: bf16[128,128], index: 3, kind: input, shape index: {}]   ;;  %s561_s4 = inlined_call_operand.vmem [shape: f32[1,128], index: 4, kind: input, shape index: {}]   ;;  %s562_s5 = inlined_call_operand.hbm [shape: f32[16,128], index: 5, kind: output, shape index: {}]  }
   0x1   :  { %11 = vsyncpa [#allocation7], 0 }
   0x2   :  { %12 = vsyncpa [#allocation5], 0  ;;  %s30_s20 = sshll.u32 %s558_s1, 4  ;;  %s501_s21 = smov [#allocation6]   ;;  %s31_s20 = int_to_ptr.hbm [resolvable:$true] %s30_s20 }
   0x3   :  { %s32_s22 = sshll.u32 %s501_s21, 4  ;;  %s17_s25 = sshll.u32 %s557_s0, 4  ;;  %s33_s22 = int_to_ptr.vmem [resolvable:$true] %s32_s22  ;;  %s18_s25 = int_to_ptr.hbm [resolvable:$true] %s17_s25 }
   0x4   :  { %s502_s26 = smov 64   ;;  %s503_s27 = smov 4  }
   0x5   :  { %38 = dma.hbm_to_vmem [thread:$0]  %s31_s20, 1024, %s33_s22, [#allocation7], %s502_s26, %s502_s26, %s503_s27  }
   0x6   :  { %s504_s28 = smov [#allocation3]   ;;  %s45_s7 = sshll.u32 %s560_s3, 4  ;;  %s46_s7 = int_to_ptr.hbm [resolvable:$true] %s45_s7 }
   0x7   :  { %s19_s29 = sshll.u32 %s504_s28, 4  ;;  %s505_s1 = smov [#allocation8]   ;;  %s20_s29 = int_to_ptr.vmem [resolvable:$true] %s19_s29 }
   0x8   :  { %25 = dma.hbm_to_vmem [thread:$0]  %s18_s25, 128, %s20_s29, [#allocation4], %s502_s26, %s502_s26, %s503_s27  }
   0x9   :  { %s47_s8 = sshll.u32 %s505_s1, 4  ;;  %s48_s8 = int_to_ptr.vmem [resolvable:$true] %s47_s8 }
   0xa   :  { %53 = dma.hbm_to_vmem [thread:$0]  %s46_s7, 1024, %s48_s8, [#allocation7], %s502_s26, %s502_s26, %s503_s27  }
   0xb   :  { %495 = dma.done.wait [#allocation4], 128  }
   0xc   :  { %496 = vsyncadd [#allocation4], 4294967168 }
   0xd   :  { %497 = dma.done.wait [#allocation7], 2048  }
   0xe   :  { %498 = vsyncadd [#allocation7], 4294965248  ;;  %v376_v0 = vld [vmem:[#allocation6 + $0x38] sm:$0xff]  ;;  %v375_v1 = vld [vmem:[#allocation6 + $0x30] sm:$0xff]  ;;  %s506_s10 = smov [#allocation9]   ;;  %s286_s14 = sshll.u32 %s562_s5, 4  ;;  %s287_s14 = int_to_ptr.hbm [resolvable:$true] %s286_s14 }
   0xf   :  { %150 = vmatpush.bf16.msra.mxu0 %v376_v0  ;;  %v374_v2 = vld [vmem:[#allocation6 + $0x28] sm:$0xff]  ;;  %v373_v3 = vld [vmem:[#allocation6 + $0x20] sm:$0xff]  ;;  %v372_v4 = vld [vmem:[#allocation6 + $0x18] sm:$0xff]  ;;  %s284_s11 = sshll.u32 %s506_s10, 4  ;;  %s507_s15 = smov 128   ;;  %s285_s11 = int_to_ptr.vmem [resolvable:$true] %s284_s11 }
  0x10   :  { %v371_v5 = vld [vmem:[#allocation6 + $0x10] sm:$0xff]  ;;  %v370_v6 = vld [vmem:[#allocation6 + $0x8] sm:$0xff]  ;;  %v369_v7 = vld [vmem:[#allocation6] sm:$0xff]  ;;  %s508_s16 = smov 8  }
  0x11   :  { %v368_v8 = vld [vmem:[#allocation3] sm:$0xff]  ;;  %v383_v10 = vld [vmem:[#allocation8 + $0x30] sm:$0xff]  ;;  %v382_v11 = vld [vmem:[#allocation8 + $0x28] sm:$0xff] }
  0x12   :  { %v384_v9 = vld [vmem:[#allocation8 + $0x38] sm:$0xff]  ;;  %v381_v12 = vld [vmem:[#allocation8 + $0x20] sm:$0xff]  ;;  %v379_v14 = vld [vmem:[#allocation8 + $0x10] sm:$0xff] }
  0x13   :  { %151 = vmatpush.bf16.msra.mxu0 %v375_v1  ;;  %249 = vmatpush.bf16.msra.mxu1 %v384_v9  ;;  %v380_v13 = vld [vmem:[#allocation8 + $0x18] sm:$0xff]  ;;  %v378_v15 = vld [vmem:[#allocation8 + $0x8] sm:$0xff]  ;;  %v377_v16 = vld [vmem:[#allocation8] sm:$0xff] }
  0x14   :  { %v393_v17 = vld [vmem:[%s559_s2] ss:$0 sm:$0xff] }
  0x15   :  { %v394_v41 = vld [vmem:[%s561_s4] ss:$0 sm:$0xff] }
  0x17   :  { %152 = vmatpush.bf16.msra.mxu0 %v374_v2  ;;  %250 = vmatpush.bf16.msra.mxu1 %v383_v10 }
  0x1b   :  { %153 = vmatpush.bf16.msra.mxu0 %v373_v3  ;;  %251 = vmatpush.bf16.msra.mxu1 %v382_v11 }
  0x1f   :  { %154 = vmatpush.bf16.msra.mxu0 %v372_v4  ;;  %252 = vmatpush.bf16.msra.mxu1 %v381_v12 }
  0x23   :  { %155 = vmatpush.bf16.msra.mxu0 %v371_v5  ;;  %253 = vmatpush.bf16.msra.mxu1 %v380_v13 }
  0x27   :  { %156 = vmatpush.bf16.msra.mxu0 %v370_v6  ;;  %254 = vmatpush.bf16.msra.mxu1 %v379_v14 }
  0x2b   :  { %157 = vmatpush.bf16.msra.mxu0 %v369_v7  ;;  %255 = vmatpush.bf16.msra.mxu1 %v378_v15 }
  0x2e   :  { %158 = vmatmul.bf16.vlgmr.msra.gmra.mxu0 %v368_v8 }
  0x2f   :  { %256 = vmatpush.bf16.msra.mxu1 %v377_v16 }
  0xab   :  { %v159_v18 = vpop.f32.mrf.mxu0 }
  0xac   :  { %v160_v19 = vadd.f32 %v393_v17, %v159_v18 }
  0xae   :  { %v166_v20 = vmul.f32 %v160_v19, %v160_v19  ;;  %v164_v35 = vmul.f32 0.5, %v160_v19 }
  0xb0   :  { %v168_v21 = vmul.f32 %v166_v20, %v160_v19 }
  0xb2   :  { %v170_v22 = vmul.f32 0.044715, %v168_v21 }
  0xb3   :  { %v161_v23 = vpop.f32.mrf.mxu0 }
  0xb4   :  { %v162_v24 = vadd.f32 %v393_v17, %v161_v23  ;;  %v172_v25 = vadd.f32 %v170_v22, %v160_v19 }
  0xb6   :  { %v167_v26 = vmul.f32 %v162_v24, %v162_v24  ;;  %v174_v28 = vmul.f32 0.7978846, %v172_v25  ;;  %v165_v36 = vmul.f32 0.5, %v162_v24 }
  0xb8   :  { %v169_v27 = vmul.f32 %v167_v26, %v162_v24  ;;  %395 = vtanh.f32 %v174_v28 }
  0xba   :  { %v171_v29 = vmul.f32 0.044715, %v169_v27 }
  0xbc   :  { %v173_v30 = vadd.f32 %v171_v29, %v162_v24 }
  0xbe   :  { %v175_v31 = vmul.f32 0.7978846, %v173_v30  ;;  %v396_v32 = vpop.eup %395 }
  0xbf   :  { %v178_v33 = vadd.f32 1.0, %v396_v32 }
  0xc0   :  { %397 = vtanh.f32 %v175_v31 }
  0xc1   :  { %v180_v38 = vmul.f32 %v178_v33, %v164_v35 }
  0xc6   :  { %v398_v34 = vpop.eup %397 }
  0xc7   :  { %v179_v37 = vadd.f32 1.0, %v398_v34 }
  0xc9   :  { %v181_v39 = vmul.f32 %v179_v37, %v165_v36 }
  0xcb   :  { %v184_v40 = vpack.c.bf16 %v181_v39, %v180_v38 }
  0xcd   :  { %257 = vmatmul.bf16.vlgmr.msra.gmra.mxu1 %v184_v40 }
 0x14a   :  { %v258_v42 = vpop.f32.mrf.mxu1 }
 0x14b   :  { %v276_v43 = vadd.f32 %v394_v41, %v258_v42 }
 0x14d   :  { %278 = vst [vmem:[#allocation9] sm:$0xff] %v276_v43 }
 0x152   :  { %v260_v44 = vpop.f32.mrf.mxu1 }
 0x153   :  { %v277_v45 = vadd.f32 %v394_v41, %v260_v44 }
 0x155   :  { %279 = vst [vmem:[#allocation9 + $0x8] sm:$0xff] %v277_v45 }
 0x156   :  { %292 = dma.vmem_to_hbm [thread:$0]  %s285_s11, 256, %s287_s14, [#allocation5], %s507_s15, %s507_s15, %s508_s16  }
 0x157   :  { %499 = dma.done.wait [#allocation5], 256  }
 0x158   :  { %500 = vsyncadd [#allocation5], 4294967040 }
 0x159   :  { %297 = vsyncpa [#allocation4], 1 }
 0x15a   :  { %298 = vsyncpa [#allocation7], 1 }
 0x15b   :  { %299 = vsyncpa [#allocation5], 1 }

</bundles_post_ra>
